<compile_context>
chip_gen: v5e
topology: v5e:2x2
jax: 0.10.0
libtpu: 0.0.40
codegen_flags: <defaults>
</compile_context>

<pallas_src>
from functools import partial

import jax
import jax.numpy as jnp
from jax.experimental import pallas as pl
from jax.experimental.pallas import tpu as pltpu


# ---------------------------------------------------------------------------
# Quantization parameter containers (same math as the PyTorch classes)
# ---------------------------------------------------------------------------
class QuantizationParams:
    def __init__(self, q_type):
        self.q_type = q_type


class SignedFixedQuantizationParams(QuantizationParams):
    def __init__(self, bit_width, int_bit_width, q_type):
        super().__init__(q_type)
        self.bit_width = bit_width
        self.int_bit_width = int_bit_width
        self.frac_bit_width = bit_width - int_bit_width
        self.prescale = 2.0 ** self.frac_bit_width
        self.postscale = 2.0 ** (-self.frac_bit_width)
        self.min_val = -(2.0 ** (int_bit_width - 1))
        self.max_val = -self.min_val - self.postscale


class UnsignedFixedQuantizationParams(QuantizationParams):
    def __init__(self, bit_width, int_bit_width, q_type):
        super().__init__(q_type)
        self.bit_width = bit_width
        self.int_bit_width = int_bit_width
        self.frac_bit_width = bit_width - int_bit_width
        self.prescale = 2.0 ** self.frac_bit_width
        self.postscale = 2.0 ** (-self.frac_bit_width)
        self.min_val = 0.0
        self.max_val = 2.0 ** int_bit_width - self.postscale


# ---------------------------------------------------------------------------
# Pallas kernel bodies (elementwise hot path; cast to f32 in-kernel, write
# the original dtype directly -> no extra f32 HBM round trip for bf16 inputs)
# ---------------------------------------------------------------------------
def _binary_kernel(x_ref, o_ref):
    x = x_ref[...].astype(jnp.float32)
    o_ref[...] = jnp.sign(x).astype(o_ref.dtype)


def _fixed_kernel(x_ref, o_ref, *, prescale, postscale, min_val, max_val):
    # TODO(synk): on v6e/v7x bf16 inputs could stay in bf16 (halves VALU work),
    # but we keep f32 math so the result matches the f32 reference exactly.
    x = x_ref[...].astype(jnp.float32)
    q = x * prescale
    # Round-to-nearest with ties toward zero == torch's floor/ceil tie
    # overrides.  ceil(|q| - 0.5) with a sign select is ~5 VPU ops/element
    # (validated against the literal torch translation below, incl. +-0.5 ties,
    # +-0 and clipped values) -- keeps v7x HBM-bound instead of VALU-bound.
    a = jnp.ceil(jnp.abs(q) - 0.5)
    t = jnp.where(q < 0.0, -a, a)
    y = jnp.clip(t * postscale, min_val, max_val)
    o_ref[...] = y.astype(o_ref.dtype)


# Pure-JAX fallbacks (used only for the <128-element tail of unaligned shapes
# and for inputs smaller than 128 elements).
def _binary_jax(x):
    return jnp.sign(x.astype(jnp.float32)).astype(x.dtype)


def _fixed_jax(x, *, prescale, postscale, min_val, max_val):
    q = x.astype(jnp.float32) * prescale
    a = jnp.ceil(jnp.abs(q) - 0.5)
    t = jnp.where(q < 0.0, -a, a)
    return jnp.clip(t * postscale, min_val, max_val).astype(x.dtype)


# ---------------------------------------------------------------------------
# Tiling policy + pallas_call wrapper
# ---------------------------------------------------------------------------
_LANE_CANDIDATES = (1024, 512, 256, 128)    # widest lane-dense layout dividing n
_TARGET_BLOCK_BYTES = 4 << 20               # ~4 MiB blocks: 2 in + 2 out bufs = 16 MiB
_SMALL_SINGLE_BLOCK_BYTES = 1 << 20         # below ~1 MiB a single block is fine
_VMEM_LIMIT_BYTES = 32 << 20                # safe on v5e/v6e and within v7x scoped VMEM


def _round_down(v, m):
    return (v // m) * m


def _round_up(v, m):
    return -(-v // m) * m


def _choose_lanes(n):
    for lanes in _LANE_CANDIDATES:
        if n % lanes == 0:
            return lanes
    return None


def _select_blocks(rows, lanes, itemsize):
    """Byte-targeted tile selection.

    Guarantees:
      * blocks are ~_TARGET_BLOCK_BYTES (dtype-aware),
      * the grid has >= 2 (roughly balanced) programs for anything above ~1 MiB
        (DMA overlap + v7x two-TensorCore sharding),
      * block dims are multiples of (8, 128) or equal to the full array dims.
    """
    total_bytes = rows * lanes * itemsize
    if total_bytes <= _SMALL_SINGLE_BLOCK_BYTES:
        return rows, lanes                      # tiny tensors: one block

    row_bytes = lanes * itemsize
    if rows > 8 and 8 * row_bytes <= _TARGET_BLOCK_BYTES:
        # Common case: keep the full lane width, tile along rows.
        block_lanes = lanes
        block_rows = _round_down(_TARGET_BLOCK_BYTES // row_bytes, 8)
        # cap so there are at least 2 roughly balanced programs
        block_rows = min(block_rows, _round_up(_round_up(rows, 2) // 2, 8))
        block_rows = max(8, block_rows)
        return block_rows, block_lanes

    # Few rows, or a single 8-row stripe already exceeds the byte target:
    # tile along lanes instead.
    block_rows = rows if rows <= 8 else 8
    block_lanes = _round_down(_TARGET_BLOCK_BYTES // (block_rows * itemsize), 128)
    block_lanes = max(128, min(block_lanes, lanes))
    if block_rows >= rows and block_lanes >= lanes:
        # still a single program -> split the lane axis in half
        block_lanes = max(128, _round_down(_round_up(lanes, 2) // 2, 128))
    return block_rows, block_lanes


def _run_slab(kernel_body, slab):
    rows, lanes = slab.shape
    itemsize = slab.dtype.itemsize
    block_rows, block_lanes = _select_blocks(rows, lanes, itemsize)
    grid = (pl.cdiv(rows, block_rows), pl.cdiv(lanes, block_lanes))
    n = rows * lanes

    return pl.pallas_call(
        kernel_body,
        out_shape=jax.ShapeDtypeStruct((rows, lanes), slab.dtype),
        grid_spec=pltpu.PrefetchScalarGridSpec(
            num_scalar_prefetch=0,
            grid=grid,
            in_specs=[pl.BlockSpec((block_rows, block_lanes), lambda i, j: (i, j))],
            out_specs=pl.BlockSpec((block_rows, block_lanes), lambda i, j: (i, j)),
        ),
        compiler_params=pltpu.CompilerParams(
            # TODO(synk): verify on a profile that both v7x TensorCores are used;
            # if one TC idles, switch the leading axis to pltpu.CORE_PARALLEL.
            dimension_semantics=("parallel", "parallel"),
            vmem_limit_bytes=_VMEM_LIMIT_BYTES,
        ),
        cost_estimate=pl.CostEstimate(
            flops=8 * n, transcendentals=0, bytes_accessed=2 * n * itemsize),
    )(slab)


def _run_elementwise(kernel_body, jax_fallback, x):
    orig_shape = x.shape

    # Trailing dim already lane-aligned: tile the array directly (only collapse
    # leading dims -> no chance of a relayout copy at the kernel boundary).
    if x.ndim >= 2 and x.shape[-1] > 0 and x.shape[-1] % 128 == 0:
        slab = x.reshape(-1, x.shape[-1])
        return _run_slab(kernel_body, slab).reshape(orig_shape)

    flat = x.reshape(-1)
    n = flat.shape[0]

    lanes = _choose_lanes(n)
    if lanes is not None:
        slab = flat.reshape(n // lanes, lanes)
        return _run_slab(kernel_body, slab).reshape(orig_shape)

    # Unaligned element count (rare): kernel on the 128-aligned prefix, plain
    # JAX on the <128-element tail -- no whole-tensor pad copy.
    n_main = _round_down(n, 128)
    if n_main == 0:
        return jax_fallback(flat).reshape(orig_shape)
    lanes = _choose_lanes(n_main)
    main = _run_slab(kernel_body, flat[:n_main].reshape(n_main // lanes, lanes))
    tail = jax_fallback(flat[n_main:])
    # TODO(synk): the concatenate still costs one output-sized copy; removing it
    # needs a masked last-block store with manual 1-D DMA plumbing.
    return jnp.concatenate([main.reshape(-1), tail]).reshape(orig_shape)


# ---------------------------------------------------------------------------
# Module wrapper
# ---------------------------------------------------------------------------
class ActivationQuantizationScheme:
    """JAX/Pallas port of the PyTorch ActivationQuantizationScheme forward."""

    def __init__(self, q_type, threshold=None, bit_width=None, int_bit_width=None):
        if q_type == "identity":
            self.q_params = QuantizationParams(q_type)
            self._kernel = None
            self._jax_fn = None
        elif q_type in ("fixed_unsigned", "fixed_signed"):
            cls = (UnsignedFixedQuantizationParams if q_type == "fixed_unsigned"
                   else SignedFixedQuantizationParams)
            self.q_params = cls(bit_width, int_bit_width, q_type)
            kw = dict(prescale=self.q_params.prescale,
                      postscale=self.q_params.postscale,
                      min_val=self.q_params.min_val,
                      max_val=self.q_params.max_val)
            self._kernel = partial(_fixed_kernel, **kw)
            self._jax_fn = partial(_fixed_jax, **kw)
        elif q_type == "binary":
            self.q_params = QuantizationParams(q_type)
            self._kernel = _binary_kernel
            self._jax_fn = _binary_jax
        else:
            raise Exception("Unknown quantization scheme: {}.".format(q_type))
        # TODO(synk): backward-pass straight-through-estimator semantics are not
        # implemented (forward-only kernel, as requested).

    def __call__(self, x):
        if self._kernel is None:          # identity: no HBM round trip
            return x
        return _run_elementwise(self._kernel, self._jax_fn, x)


# ---------------------------------------------------------------------------
# Pure-JAX reference (literal translation of the torch `quantize`)
# ---------------------------------------------------------------------------
def _ref_fixed(x, p):
    q = x.astype(jnp.float32) * p.prescale
    r = jnp.round(q)                      # non-ties: same as torch.round
    f = jnp.floor(q)
    c = jnp.ceil(q)
    frac = q - jnp.trunc(q)               # torch: q - q.int()
    t = jnp.where(frac == 0.5, f, r)
    t = jnp.where(frac == -0.5, c, t)
    return jnp.clip(t * p.postscale, p.min_val, p.max_val)


if __name__ == "__main__":
    key = jax.random.PRNGKey(0)
    x = jax.random.normal(key, (2, 4, 16, 16), dtype=jnp.float32) * 4.0

    # fixed_signed (f32, 2048 elems -> (2, 1024) single block)
    m_signed = ActivationQuantizationScheme("fixed_signed", bit_width=8, int_bit_width=4)
    y_signed = jax.block_until_ready(m_signed(x))
    ref_signed = _ref_fixed(x, m_signed.q_params)
    assert y_signed.shape == x.shape and y_signed.dtype == x.dtype
    assert jnp.max(jnp.abs(y_signed - ref_signed)) < 1e-6

    # fixed_unsigned
    m_unsigned = ActivationQuantizationScheme("fixed_unsigned", bit_width=8, int_bit_width=4)
    y_unsigned = jax.block_until_ready(m_unsigned(x))
    ref_unsigned = _ref_fixed(x, m_unsigned.q_params)
    assert jnp.max(jnp.abs(y_unsigned - ref_unsigned)) < 1e-6

    # binary
    m_bin = ActivationQuantizationScheme("binary")
    y_bin = jax.block_until_ready(m_bin(x))
    assert jnp.max(jnp.abs(y_bin - jnp.sign(x))) < 1e-6

    # identity (kernel bypass)
    m_id = ActivationQuantizationScheme("identity")
    y_id = jax.block_until_ready(m_id(x))
    assert jnp.max(jnp.abs(y_id - x)) < 1e-6

    # bf16 input: dtype preserved, cast happens inside the kernel
    x_bf16 = (jax.random.normal(jax.random.PRNGKey(1), (2, 4, 16, 16)) * 4.0).astype(jnp.bfloat16)
    y_bf16 = jax.block_until_ready(m_signed(x_bf16))
    ref_bf16 = _ref_fixed(x_bf16, m_signed.q_params).astype(jnp.bfloat16)
    assert y_bf16.dtype == jnp.bfloat16
    assert jnp.max(jnp.abs(y_bf16.astype(jnp.float32) - ref_bf16.astype(jnp.float32))) < 1e-6

    # unaligned size (1155 elems -> kernel on 1152-element prefix, JAX tail)
    x_odd = jax.random.normal(jax.random.PRNGKey(2), (3, 5, 7, 11), dtype=jnp.float32) * 4.0
    y_odd = jax.block_until_ready(m_unsigned(x_odd))
    assert jnp.max(jnp.abs(y_odd - _ref_fixed(x_odd, m_unsigned.q_params))) < 1e-6

    # explicit tie handling check, tiled to 128 elems so it runs in-kernel
    base_tie = jnp.array([0.15625, -0.15625, 0.21875, -0.21875, 3.9, -7.7, 100.0, -100.0],
                         dtype=jnp.float32)
    x_tie = jnp.tile(base_tie, 16)
    y_tie = jax.block_until_ready(m_signed(x_tie))
    assert jnp.max(jnp.abs(y_tie - _ref_fixed(x_tie, m_signed.q_params))) < 1e-6

    # trailing-dim-aligned path + multi-block grid (2 MiB -> 2 programs, "parallel")
    x_big = jax.random.normal(jax.random.PRNGKey(3), (8, 64, 1024), dtype=jnp.float32) * 4.0
    y_big = jax.block_until_ready(m_signed(x_big))
    assert jnp.max(jnp.abs(y_big - _ref_fixed(x_big, m_signed.q_params))) < 1e-6

    # ragged last row-block (2700 rows, 1352-row blocks -> boundary masking path)
    x_rag = jax.random.normal(jax.random.PRNGKey(4), (9, 300, 128), dtype=jnp.float32) * 4.0
    y_rag = jax.block_until_ready(m_unsigned(x_rag))
    assert jnp.max(jnp.abs(y_rag - _ref_fixed(x_rag, m_unsigned.q_params))) < 1e-6

    print("KERNEL_OK")
</pallas_src>

<mosaic_0001>
module attributes {stable_mosaic.version = 11 : i64} {
  func.func @_fixed_kernel(%arg0: i32, %arg1: i32, %arg2: memref<2x1024xf32, #tpu.memory_space<vmem>>, %arg3: memref<2x1024xf32, #tpu.memory_space<vmem>>) attributes {dimension_semantics = [#tpu.dimension_semantics<parallel>, #tpu.dimension_semantics<parallel>], iteration_bounds = array<i64: 1, 1>, scalar_prefetch = 0 : i64, scratch_operands = 0 : i64, tpu.core_type = #tpu.core_type<tc>, window_params = [{transform_indices = @transform_0, window_bounds = array<i64: 2, 1024>}, {transform_indices = @transform_1, window_bounds = array<i64: 2, 1024>}]} {
    %c0 = arith.constant 0 : index
    %c0_0 = arith.constant 0 : index
    %0 = vector.load %arg2[%c0, %c0_0] : memref<2x1024xf32, #tpu.memory_space<vmem>>, vector<2x1024xf32>
    %cst = arith.constant 1.600000e+01 : f32
    %1 = vector.broadcast %cst : f32 to vector<2x1024xf32>
    %2 = arith.mulf %0, %1 : vector<2x1024xf32>
    %3 = math.absf %2 : vector<2x1024xf32>
    %cst_1 = arith.constant 5.000000e-01 : f32
    %4 = vector.broadcast %cst_1 : f32 to vector<2x1024xf32>
    %5 = arith.subf %3, %4 : vector<2x1024xf32>
    %6 = math.ceil %5 : vector<2x1024xf32>
    %cst_2 = arith.constant 0.000000e+00 : f32
    %7 = vector.broadcast %cst_2 : f32 to vector<2x1024xf32>
    %8 = arith.cmpf olt, %2, %7 : vector<2x1024xf32>
    %cst_3 = arith.constant 0.000000e+00 : f32
    %9 = vector.broadcast %cst_3 : f32 to vector<2x1024xf32>
    %10 = arith.subf %9, %6 : vector<2x1024xf32>
    %11 = arith.select %8, %10, %6 : vector<2x1024xi1>, vector<2x1024xf32>
    %cst_4 = arith.constant 6.250000e-02 : f32
    %12 = vector.broadcast %cst_4 : f32 to vector<2x1024xf32>
    %13 = arith.mulf %11, %12 : vector<2x1024xf32>
    %cst_5 = arith.constant -8.000000e+00 : f32
    %cst_6 = arith.constant 7.937500e+00 : f32
    %14 = vector.broadcast %cst_5 : f32 to vector<2x1024xf32>
    %15 = arith.maximumf %14, %13 : vector<2x1024xf32>
    %16 = vector.broadcast %cst_6 : f32 to vector<2x1024xf32>
    %17 = arith.minimumf %16, %15 : vector<2x1024xf32>
    %c0_7 = arith.constant 0 : index
    %c0_8 = arith.constant 0 : index
    %18 = vector.load %arg3[%c0_7, %c0_8] : memref<2x1024xf32, #tpu.memory_space<vmem>>, vector<2x1024xf32>
    tpu.vector_store %arg3[%c0_7, %c0_8], %17 {strides = array<i32>} : memref<2x1024xf32, #tpu.memory_space<vmem>>, vector<2x1024xf32>,
    return
  }
  func.func @transform_0(%arg0: i32, %arg1: i32) -> (i32, i32) {
    %c0_i32 = arith.constant 0 : i32
    return %arg0, %arg1 : i32, i32
  }
  func.func @transform_1(%arg0: i32, %arg1: i32) -> (i32, i32) {
    %c0_i32 = arith.constant 0 : i32
    return %arg0, %arg1 : i32, i32
  }
}

</mosaic_0001>

<bundles_post_ra>
// kernel: tpu_custom_call.1
= control target key start
LH: loop header
LB: loop body
LE: loop exit
PB: predicated region body
PF: predicated region fallthrough
CT: control target
= control target key end

     0   :  { %6 = vsyncpa [#allocation3], 0  ;;  %s138_s0 = inlined_call_operand.hbm [shape: f32[2,1024], index: 0, kind: input, shape index: {}]   ;;  %s139_s1 = inlined_call_operand.hbm [shape: f32[2,1024], index: 1, kind: output, shape index: {}]  }
   0x1   :  { %7 = vsyncpa [#allocation4], 0  ;;  %s13_s8 = sshll.u32 %s138_s0, 4  ;;  %s120_s9 = smov [#allocation2]   ;;  %s14_s8 = int_to_ptr.hbm [resolvable:$true] %s13_s8 }
   0x2   :  { %s15_s10 = sshll.u32 %s120_s9, 4  ;;  %s16_s10 = int_to_ptr.vmem [resolvable:$true] %s15_s10 }
   0x3   :  { %18 = dma.hbm_to_vmem [thread:$0]  %s14_s8, 256, %s16_s10, [#allocation3]  }
   0x4   :  { %116 = dma.done.wait [#allocation3], 256  }
   0x5   :  { %117 = vsyncadd [#allocation3], 4294967040  ;;  %v23_v0 = vld [vmem:[#allocation2] sm:$0xff]  ;;  %v24_v1 = vld [vmem:[#allocation2 + $0x8] sm:$0xff]  ;;  %s121_s0 = smov [#allocation5]   ;;  %s54_s14 = sshll.u32 %s139_s1, 4  ;;  %s55_s14 = int_to_ptr.hbm [resolvable:$true] %s54_s14 }
   0x6   :  { %v25_v2 = vmul.f32 16.0, %v23_v0  ;;  %v26_v3 = vmul.f32 16.0, %v24_v1  ;;  %s52_s11 = sshll.u32 %s121_s0, 4  ;;  %s53_s11 = int_to_ptr.vmem [resolvable:$true] %s52_s11 }
   0x8   :  { %v27_v4 = vand.u32 2147483647, %v25_v2  ;;  %v28_v5 = vand.u32 2147483647, %v26_v3  ;;  %vm33_vm0 = vcmp.lt.f32.partialorder %v25_v2, 0.0  ;;  %vm34_vm1 = vcmp.lt.f32.partialorder %v26_v3, 0.0 }
   0xa   :  { %v64_v6 = vadd.f32 -0.5, %v27_v4  ;;  %v65_v7 = vadd.f32 -0.5, %v28_v5 }
   0xc   :  { %v31_v8 = vceil.f32 %v64_v6  ;;  %v32_v9 = vceil.f32 %v65_v7 }
   0xe   :  { %v35_v10 = vsub.f32 0.0, %v31_v8  ;;  %v36_v11 = vsub.f32 0.0, %v32_v9 }
  0x10   :  { %v37_v12 = vsel %vm33_vm0, %v35_v10, %v31_v8  ;;  %v38_v13 = vsel %vm34_vm1, %v36_v11, %v32_v9 }
  0x11   :  { %v39_v14 = vmul.f32 0.0625, %v37_v12  ;;  %v40_v15 = vmul.f32 0.0625, %v38_v13 }
  0x13   :  { %v41_v16 = vmax.f32 %v39_v14, -8.0  ;;  %v42_v17 = vmax.f32 %v40_v15, -8.0 }
  0x15   :  { %v43_v18 = vmin.f32 %v41_v16, 7.9375  ;;  %v44_v19 = vmin.f32 %v42_v17, 7.9375 }
  0x17   :  { %45 = vst [vmem:[#allocation5] sm:$0xff] %v43_v18 }
  0x18   :  { %46 = vst [vmem:[#allocation5 + $0x8] sm:$0xff] %v44_v19 }
  0x19   :  { %57 = dma.vmem_to_hbm [thread:$0]  %s53_s11, 256, %s55_s14, [#allocation4]  }
  0x1a   :  { %118 = dma.done.wait [#allocation4], 256  }
  0x1b   :  { %119 = vsyncadd [#allocation4], 4294967040 }
  0x1c   :  { %62 = vsyncpa [#allocation3], 1 }
  0x1d   :  { %63 = vsyncpa [#allocation4], 1 }

</bundles_post_ra>
